<compile_context>
chip_gen: v7x
topology: tpu7x:2x2x1
jax: 0.10.0
libtpu: 0.0.40
codegen_flags: <defaults>
</compile_context>

<pallas_src>
import jax
import jax.numpy as jnp
from jax.experimental import pallas as pl
from jax.experimental.pallas import tpu as pltpu


# ------------------------------------------------------------------ config ---
# Synthetic stand-in for _load_config(config_path).
LAYER_DEF = [
    ("Linear", {"in_features": 32, "out_features": 64}),
    ("ReLU", {}),
    ("Linear", {"in_features": 64, "out_features": 32}),
    ("Sigmoid", {}),
]

D_IN = LAYER_DEF[0][1]["in_features"]       # 32
D_HID = LAYER_DEF[0][1]["out_features"]     # 64
D_OUT = LAYER_DEF[2][1]["out_features"]     # 32

# Sigmoid output lies in (0, 1); bf16 abs error there is ~4e-3, inside the
# 2e-2 tolerance already implied by bf16 matmul operands.
# TODO(synk): set OUT_DTYPE = jnp.float32 if downstream consumers need f32.
OUT_DTYPE = jnp.bfloat16

MAX_TM = 8192        # rows per grid step (~1.5 MB HBM traffic/step)
SPLIT_ROWS = 2048    # batches at least this big get >= 2 grid steps (v7x: 2 TCs)
SUBLANE = 16         # bf16 native sublane packing


def _round_up(n, m):
    return ((n + m - 1) // m) * m


# ------------------------------------------------------------------ kernel ---
def mlp_kernel(x_ref, w1_ref, b1_ref, w2_ref, b2_ref, o_ref):
    """Fused: sigmoid(relu(x @ W1 + b1) @ W2 + b2) for one (TM, d_in) row tile.

    x arrives f32 and is cast to bf16 in-kernel (saves a separate XLA cast
    pass over HBM).  Weights are bf16 (in, out); matmuls accumulate in f32;
    bias adds / ReLU / sigmoid are f32 on the real 32 output columns only.
    """
    x = x_ref[...].astype(jnp.bfloat16)                                # in-kernel cast
    h = jnp.dot(x, w1_ref[...], preferred_element_type=jnp.float32)    # MXU, f32 acc
    h = jnp.maximum(h + b1_ref[...], 0.0)                              # bias + ReLU (VPU)
    y = jnp.dot(h.astype(jnp.bfloat16), w2_ref[...],                   # MXU, f32 acc
                preferred_element_type=jnp.float32)
    y = y + b2_ref[...]                                                # bias (VPU)
    o_ref[...] = jax.nn.sigmoid(y).astype(o_ref.dtype)                 # Sigmoid (EUP), 32 cols


# --------------------------------------------------------------- param pack ---
def pack_params(params):
    """One-time conversion from PyTorch (out, in) layout to kernel layout."""
    w1, b1, w2, b2 = params
    w1_t = w1.T.astype(jnp.bfloat16)                  # (d_in, d_hid)
    b1_r = b1.reshape(1, -1).astype(jnp.float32)      # (1, d_hid)
    w2_t = w2.T.astype(jnp.bfloat16)                  # (d_hid, d_out) — no lane pad
    b2_r = b2.reshape(1, -1).astype(jnp.float32)      # (1, d_out)
    return w1_t, b1_r, w2_t, b2_r


# ------------------------------------------------------------------ tiling ---
def _tiling(batch):
    """Pick (tm, batch_pad, n_tiles): 16-row granularity, tiny padding waste,
    big tiles to amortize per-step cost, >=2 tiles for large batches (v7x)."""
    bp = _round_up(batch, SUBLANE)
    n_tiles = pl.cdiv(bp, MAX_TM)
    if bp >= SPLIT_ROWS:
        n_tiles = max(n_tiles, 2)
    tm = _round_up(pl.cdiv(bp, n_tiles), SUBLANE)
    return tm, tm * n_tiles, n_tiles


# ------------------------------------------------------------------ forward ---
@jax.jit
def model_forward(x, packed):
    """Apply the whole layer stack in one gridded pallas_call."""
    w1_t, b1_r, w2_t, b2_r = packed
    batch = x.shape[0]
    tm, batch_pad, n_tiles = _tiling(batch)
    if batch_pad != batch:
        x = jnp.pad(x, ((0, batch_pad - batch), (0, 0)))

    out_isz = jnp.dtype(OUT_DTYPE).itemsize
    cost = pl.CostEstimate(
        flops=2 * batch_pad * (D_IN * D_HID + D_HID * D_OUT),
        transcendentals=batch_pad * D_OUT,                             # sigmoid (real cols)
        bytes_accessed=(batch_pad * D_IN * x.dtype.itemsize            # x (f32 in HBM)
                        + batch_pad * D_OUT * out_isz                  # out (bf16, 32 cols)
                        + (D_IN * D_HID + D_HID * D_OUT) * 2           # weights (bf16)
                        + (D_HID + D_OUT) * 4),                        # biases (f32)
    )

    out = pl.pallas_call(
        mlp_kernel,
        out_shape=jax.ShapeDtypeStruct((batch_pad, D_OUT), OUT_DTYPE),
        grid=(n_tiles,),
        in_specs=[
            pl.BlockSpec((tm, D_IN), lambda i: (i, 0)),                # streamed rows (f32)
            pl.BlockSpec((D_IN, D_HID), lambda i: (0, 0)),             # resident W1
            pl.BlockSpec((1, D_HID), lambda i: (0, 0)),                # resident b1
            pl.BlockSpec((D_HID, D_OUT), lambda i: (0, 0)),            # resident W2
            pl.BlockSpec((1, D_OUT), lambda i: (0, 0)),                # resident b2
        ],
        out_specs=pl.BlockSpec((tm, D_OUT), lambda i: (i, 0)),         # exact-shape store
        compiler_params=pltpu.CompilerParams(
            dimension_semantics=("parallel",)),                        # 2 TCs on v7x
        cost_estimate=cost,
    )(x, w1_t, b1_r, w2_t, b2_r)

    # Exact shape in columns already; only trim pad rows if any were added.
    return out if batch_pad == batch else out[:batch]


# -------------------------------------------------------------- param init ---
def init_params(key):
    k1, k2, k3, k4 = jax.random.split(key, 4)
    # PyTorch nn.Linear stores weight as (out_features, in_features).
    w1 = jax.random.normal(k1, (D_HID, D_IN), jnp.float32) * (1.0 / jnp.sqrt(D_IN))
    b1 = jax.random.normal(k2, (D_HID,), jnp.float32) * 0.01
    w2 = jax.random.normal(k3, (D_OUT, D_HID), jnp.float32) * (1.0 / jnp.sqrt(D_HID))
    b2 = jax.random.normal(k4, (D_OUT,), jnp.float32) * 0.01
    return w1, b1, w2, b2


def reference_forward(x, params):
    """Plain-JAX reference matching the PyTorch layer-by-layer semantics."""
    w1, b1, w2, b2 = params
    y = x
    y = y @ w1.T + b1          # nn.Linear
    y = jnp.maximum(y, 0.0)    # nn.ReLU
    y = y @ w2.T + b2          # nn.Linear
    y = jax.nn.sigmoid(y)      # nn.Sigmoid
    return y


# -------------------------------------------------------------------- main ---
if __name__ == "__main__":
    key = jax.random.PRNGKey(0)
    kx, kp = jax.random.split(key)

    batch = 64                 # small test shape; wrapper scales to any batch
    x = jax.random.normal(kx, (batch, D_IN), jnp.float32)

    params = init_params(kp)
    packed = pack_params(params)   # one-time (in, out) + bf16 conversion

    out = model_forward(x, packed)
    out = jax.block_until_ready(out)

    ref = reference_forward(x, params)
    assert out.shape == ref.shape, (out.shape, ref.shape)
    # bf16 matmul operands + bf16 sigmoid output -> loose tolerance (output in (0,1)).
    assert jnp.allclose(out.astype(jnp.float32), ref, atol=2e-2, rtol=2e-2), \
        "mismatch vs reference"

    print("KERNEL_OK")
</pallas_src>

<mosaic_0001>
module attributes {stable_mosaic.version = 11 : i64} {
  func.func @mlp_kernel(%arg0: i32, %arg1: memref<64x32xf32, #tpu.memory_space<vmem>>, %arg2: memref<32x64xbf16, #tpu.memory_space<vmem>>, %arg3: memref<1x64xf32, #tpu.memory_space<vmem>>, %arg4: memref<64x32xbf16, #tpu.memory_space<vmem>>, %arg5: memref<1x32xf32, #tpu.memory_space<vmem>>, %arg6: memref<64x32xbf16, #tpu.memory_space<vmem>>) attributes {dimension_semantics = [#tpu.dimension_semantics<parallel>], iteration_bounds = array<i64: 1>, scalar_prefetch = 0 : i64, scratch_operands = 0 : i64, tpu.core_type = #tpu.core_type<tc>, window_params = [{transform_indices = @transform_0, window_bounds = array<i64: 64, 32>}, {pipeline_mode = #tpu.pipeline_mode<synchronous>, transform_indices = @transform_1, window_bounds = array<i64: 32, 64>}, {pipeline_mode = #tpu.pipeline_mode<synchronous>, transform_indices = @transform_2, window_bounds = array<i64: 1, 64>}, {pipeline_mode = #tpu.pipeline_mode<synchronous>, transform_indices = @transform_3, window_bounds = array<i64: 64, 32>}, {pipeline_mode = #tpu.pipeline_mode<synchronous>, transform_indices = @transform_4, window_bounds = array<i64: 1, 32>}, {transform_indices = @transform_5, window_bounds = array<i64: 64, 32>}]} {
    %c0 = arith.constant 0 : index
    %c0_0 = arith.constant 0 : index
    %0 = vector.load %arg1[%c0, %c0_0] : memref<64x32xf32, #tpu.memory_space<vmem>>, vector<64x32xf32>
    %1 = arith.truncf %0 : vector<64x32xf32> to vector<64x32xbf16>
    %c0_1 = arith.constant 0 : index
    %c0_2 = arith.constant 0 : index
    %2 = vector.load %arg2[%c0_1, %c0_2] : memref<32x64xbf16, #tpu.memory_space<vmem>>, vector<32x64xbf16>
    %cst = arith.constant dense<0.000000e+00> : vector<64x64xf32>
    %3 = tpu.matmul %1, %2, %cst {dimension_numbers = #tpu.dot_dimension_numbers<[1], [0], [0], [1], [0, 0, 1, 1], [], []>} : vector<64x32xbf16>, vector<32x64xbf16>, vector<64x64xf32> -> vector<64x64xf32>
    %c0_3 = arith.constant 0 : index
    %c0_4 = arith.constant 0 : index
    %4 = vector.load %arg3[%c0_3, %c0_4] : memref<1x64xf32, #tpu.memory_space<vmem>>, vector<1x64xf32>
    %5 = vector.broadcast %4 : vector<1x64xf32> to vector<64x64xf32>
    %6 = arith.addf %3, %5 : vector<64x64xf32>
    %cst_5 = arith.constant 0.000000e+00 : f32
    %7 = vector.broadcast %cst_5 : f32 to vector<64x64xf32>
    %8 = arith.maximumf %6, %7 : vector<64x64xf32>
    %9 = arith.truncf %8 : vector<64x64xf32> to vector<64x64xbf16>
    %c0_6 = arith.constant 0 : index
    %c0_7 = arith.constant 0 : index
    %10 = vector.load %arg4[%c0_6, %c0_7] : memref<64x32xbf16, #tpu.memory_space<vmem>>, vector<64x32xbf16>
    %cst_8 = arith.constant dense<0.000000e+00> : vector<64x32xf32>
    %11 = tpu.matmul %9, %10, %cst_8 {dimension_numbers = #tpu.dot_dimension_numbers<[1], [0], [0], [1], [0, 0, 1, 1], [], []>} : vector<64x64xbf16>, vector<64x32xbf16>, vector<64x32xf32> -> vector<64x32xf32>
    %c0_9 = arith.constant 0 : index
    %c0_10 = arith.constant 0 : index
    %12 = vector.load %arg5[%c0_9, %c0_10] : memref<1x32xf32, #tpu.memory_space<vmem>>, vector<1x32xf32>
    %13 = vector.broadcast %12 : vector<1x32xf32> to vector<64x32xf32>
    %14 = arith.addf %11, %13 : vector<64x32xf32>
    %15 = arith.negf %14 : vector<64x32xf32>
    %16 = math.exp %15 : vector<64x32xf32>
    %cst_11 = arith.constant 1.000000e+00 : f32
    %17 = vector.broadcast %cst_11 : f32 to vector<64x32xf32>
    %18 = arith.addf %17, %16 : vector<64x32xf32>
    %19 = arith.divf %17, %18 : vector<64x32xf32>
    %20 = arith.truncf %19 : vector<64x32xf32> to vector<64x32xbf16>
    %c0_12 = arith.constant 0 : index
    %c0_13 = arith.constant 0 : index
    %21 = vector.load %arg6[%c0_12, %c0_13] : memref<64x32xbf16, #tpu.memory_space<vmem>>, vector<64x32xbf16>
    tpu.vector_store %arg6[%c0_12, %c0_13], %20 {strides = array<i32>} : memref<64x32xbf16, #tpu.memory_space<vmem>>, vector<64x32xbf16>,
    return
  }
  func.func @transform_0(%arg0: i32) -> (i32, i32) {
    %c0_i32 = arith.constant 0 : i32
    %c0_i32_0 = arith.constant 0 : i32
    return %arg0, %c0_i32 : i32, i32
  }
  func.func @transform_1(%arg0: i32) -> (i32, i32) {
    %c0_i32 = arith.constant 0 : i32
    %c0_i32_0 = arith.constant 0 : i32
    %c0_i32_1 = arith.constant 0 : i32
    return %c0_i32, %c0_i32_0 : i32, i32
  }
  func.func @transform_2(%arg0: i32) -> (i32, i32) {
    %c0_i32 = arith.constant 0 : i32
    %c0_i32_0 = arith.constant 0 : i32
    %c0_i32_1 = arith.constant 0 : i32
    return %c0_i32, %c0_i32_0 : i32, i32
  }
  func.func @transform_3(%arg0: i32) -> (i32, i32) {
    %c0_i32 = arith.constant 0 : i32
    %c0_i32_0 = arith.constant 0 : i32
    %c0_i32_1 = arith.constant 0 : i32
    return %c0_i32, %c0_i32_0 : i32, i32
  }
  func.func @transform_4(%arg0: i32) -> (i32, i32) {
    %c0_i32 = arith.constant 0 : i32
    %c0_i32_0 = arith.constant 0 : i32
    %c0_i32_1 = arith.constant 0 : i32
    return %c0_i32, %c0_i32_0 : i32, i32
  }
  func.func @transform_5(%arg0: i32) -> (i32, i32) {
    %c0_i32 = arith.constant 0 : i32
    %c0_i32_0 = arith.constant 0 : i32
    return %arg0, %c0_i32 : i32, i32
  }
}

</mosaic_0001>

<bundles_post_ra>
// kernel: model_forward.1
= control target key start
LH: loop header
LB: loop body
LE: loop exit
PB: predicated region body
PF: predicated region fallthrough
CT: control target
= control target key end

     0   :  { %vm56_vm0 = vcmask 261120   ;;  %vm185_vm1 = vcmask 523264   ;;  %vm343_vm2 = vcmask 257024   ;;  %s594_s1 = inlined_call_operand.vmem [shape: bf16[32,64], index: 1, kind: input, shape index: {}]   ;;  %s595_s0 = inlined_call_operand.vmem [shape: f32[64,32], index: 0, kind: input, shape index: {}]   ;;  %s596_s3 = inlined_call_operand.vmem [shape: bf16[64,32], index: 3, kind: input, shape index: {}]   ;;  %s597_s2 = inlined_call_operand.vmem [shape: f32[1,64], index: 2, kind: input, shape index: {}]   ;;  %s598_s4 = inlined_call_operand.vmem [shape: f32[1,32], index: 4, kind: input, shape index: {}]   ;;  %s599_s5 = inlined_call_operand.vmem [shape: bf16[64,32], index: 5, kind: output, shape index: {}]  }
   0x1   :  { %v438_v0 = vld [vmem:[%s594_s1] sm:$0xff]   ;;  %v439_v1 = vld [vmem:[%s594_s1 + $0x8] sm:$0xff]   ;;  %v23_v5 = vld [vmem:[%s595_s0 + $0x10] sm:$0xff] }
   0x2   :  { %410 = vmatprep.subr.bf16.mxu0 %v438_v0  ;;  %v21_v2 = vld [vmem:[%s595_s0] sm:$0xff]  ;;  %v22_v3 = vld [vmem:[%s595_s0 + $0x8] sm:$0xff]  ;;  %v24_v6 = vld [vmem:[%s595_s0 + $0x18] sm:$0xff] }
   0x3   :  { %411 = vmatpush3.bf16.msra.mxu0 %v438_v0  ;;  %v29_v4 = vpack.c.bf16 %v22_v3, %v21_v2  ;;  %v25_v7 = vld [vmem:[%s595_s0 + $0x20] sm:$0xff]  ;;  %v26_v8 = vld [vmem:[%s595_s0 + $0x28] sm:$0xff]  ;;  %v30_v10 = vpack.c.bf16 %v24_v6, %v23_v5  ;;  %v27_v13 = vld [vmem:[%s595_s0 + $0x30] sm:$0xff] }
   0x4   :  { %412 = vmatprep.subr.bf16.mxu0 %v439_v1  ;;  %v440_v9 = vld [vmem:[%s596_s3] sm:$0xff]   ;;  %v441_v11 = vld [vmem:[%s596_s3 + $0x8] sm:$0xff]   ;;  %v31_v12 = vpack.c.bf16 %v26_v8, %v25_v7  ;;  %v28_v14 = vld [vmem:[%s595_s0 + $0x38] sm:$0xff] }
   0x5   :  { %414 = vmatprep.mubr.msk.bf16.mxu0 %vm56_vm0, %v29_v4  ;;  %422 = vmatprep.subr.bf16.mxu1 %v440_v9  ;;  %v32_v15 = vpack.c.bf16 %v28_v14, %v27_v13  ;;  %v442_v16 = vld [vmem:[%s596_s3 + $0x10] sm:$0xff]   ;;  %v443_v17 = vld [vmem:[%s596_s3 + $0x18] sm:$0xff]   ;;  %v356_v18 = vld [vmem:[%s597_s2] ss:$0 sm:$0xff] }
   0x6   :  { %423 = vmatpush3.bf16.msra.mxu1 %v440_v9  ;;  %v363_v47 = vld [vmem:[%s598_s4] ss:$0 sm:$0xff] }
   0x7   :  { %413 = vmatpush3.bf16.msra.mxu0 %v439_v1  ;;  %424 = vmatprep.subr.bf16.mxu1 %v441_v11 }
   0xa   :  { %415 = vmatmul.mubr.msk.bf16.vlgmr.msra.gmra.mrb[0].mxu0 %vm56_vm0, %v30_v10  ;;  %425 = vmatpush3.bf16.msra.mxu1 %v441_v11 }
   0xb   :  { %418 = vmatprep.mubr.msk.bf16.mxu0 %vm56_vm0, %v31_v12  ;;  %426 = vmatprep.subr.bf16.mxu1 %v442_v16 }
   0xe   :  { %427 = vmatpush3.bf16.msra.mxu1 %v442_v16 }
   0xf   :  { %428 = vmatprep.subr.bf16.mxu1 %v443_v17 }
  0x12   :  { %419 = vmatmul.mubr.msk.bf16.gmra.mrb[4].mxu0 %vm56_vm0, %v32_v15  ;;  %429 = vmatpush3.bf16.msra.mxu1 %v443_v17 }
  0xdd   :  { %v416_v19 = vpop.f32.mrb[0].mxu0 }
  0xde   :  { %v112_v20 = vadd.f32 %v416_v19, %v356_v18  ;;  %v103_v21 = vpop.f32.mrb[1].mxu0 }
  0xdf   :  { %v104_v22 = vadd.f32 %v356_v18, %v103_v21  ;;  %v417_v23 = vpop.f32.mrb[2].mxu0 }
  0xe0   :  { %v115_v24 = vadd.f32 %v417_v23, %v356_v18  ;;  %v106_v25 = vpop.f32.mrb[3].mxu0  ;;  %v136_v27 = vmax.f32 %v112_v20, 0.0 }
  0xe1   :  { %v107_v26 = vadd.f32 %v356_v18, %v106_v25  ;;  %v134_v29 = vmax.f32 %v104_v22, 0.0 }
  0xe2   :  { %v137_v28 = vmax.f32 %v115_v24, 0.0 }
  0xe3   :  { %v135_v30 = vmax.f32 %v107_v26, 0.0 }
  0xe4   :  { %v143_v31 = vpack.c.bf16 %v137_v28, %v136_v27 }
  0xe5   :  { %v420_v32 = vpop.f32.mrb[4].mxu0  ;;  %v142_v33 = vpack.c.bf16 %v135_v30, %v134_v29 }
  0xe6   :  { %v128_v34 = vadd.f32 %v420_v32, %v356_v18  ;;  %v119_v35 = vpop.f32.mrb[5].mxu0 }
  0xe7   :  { %v120_v36 = vadd.f32 %v356_v18, %v119_v35  ;;  %v421_v37 = vpop.f32.mrb[6].mxu0  ;;  %430 = vmatprep.mubr.msk.bf16.mxu1 %vm185_vm1, %v142_v33 }
  0xe8   :  { %v131_v38 = vadd.f32 %v421_v37, %v356_v18  ;;  %v122_v39 = vpop.f32.mrb[7].mxu0  ;;  %431 = vmatmul.mubr.msk.bf16.vlgmr.msra.gmra.mrb[0].mxu1 %vm185_vm1, %v143_v31  ;;  %v140_v41 = vmax.f32 %v128_v34, 0.0 }
  0xe9   :  { %v123_v40 = vadd.f32 %v356_v18, %v122_v39  ;;  %v138_v43 = vmax.f32 %v120_v36, 0.0 }
  0xea   :  { %v141_v42 = vmax.f32 %v131_v38, 0.0 }
  0xeb   :  { %v139_v44 = vmax.f32 %v123_v40, 0.0 }
  0xec   :  { %v145_v45 = vpack.c.bf16 %v141_v42, %v140_v41 }
  0xed   :  { %v144_v46 = vpack.c.bf16 %v139_v44, %v138_v43 }
  0xef   :  { %434 = vmatprep.mubr.msk.bf16.mxu1 %vm185_vm1, %v144_v46 }
  0xf0   :  { %435 = vmatmul.mubr.msk.bf16.gmra.mrb[4].mxu1 %vm185_vm1, %v145_v45 }
 0x1bb   :  { %v432_v48 = vpop.f32.mrb[0].mxu1 }
 0x1bc   :  { %v241_v49 = vadd.f32 %v432_v48, %v363_v47  ;;  %v232_v50 = vpop.f32.mrb[1].mxu1 }
 0x1bd   :  { %v233_v51 = vadd.f32 %v363_v47, %v232_v50  ;;  %v433_v52 = vpop.f32.mrb[2].mxu1 }
 0x1be   :  { %v374_v53 = vmul.f32 -1.442695, %v241_v49  ;;  %v244_v54 = vadd.f32 %v433_v52, %v363_v47  ;;  %v235_v55 = vpop.f32.mrb[3].mxu1 }
 0x1bf   :  { %v372_v56 = vmul.f32 -1.442695, %v233_v51  ;;  %v236_v57 = vadd.f32 %v363_v47, %v235_v55 }
 0x1c0   :  { %444 = vpow2.f32 %v374_v53  ;;  %v375_v58 = vmul.f32 -1.442695, %v244_v54 }
 0x1c1   :  { %446 = vpow2.f32 %v372_v56  ;;  %v373_v59 = vmul.f32 -1.442695, %v236_v57 }
 0x1c2   :  { %448 = vpow2.f32 %v375_v58 }
 0x1c3   :  { %450 = vpow2.f32 %v373_v59  ;;  %v436_v60 = vpop.f32.mrb[4].mxu1 }
 0x1c4   :  { %v257_v61 = vadd.f32 %v436_v60, %v363_v47  ;;  %v248_v62 = vpop.f32.mrb[5].mxu1 }
 0x1c5   :  { %v249_v63 = vadd.f32 %v363_v47, %v248_v62  ;;  %v437_v0 = vpop.f32.mrb[6].mxu1 }
 0x1c6   :  { %v378_v1 = vmul.f32 -1.442695, %v257_v61  ;;  %v260_v2 = vadd.f32 %v437_v0, %v363_v47  ;;  %v251_v3 = vpop.f32.mrb[7].mxu1 }
 0x1c7   :  { %v376_v4 = vmul.f32 -1.442695, %v249_v63  ;;  %v252_v5 = vadd.f32 %v363_v47, %v251_v3 }
 0x1c8   :  { %452 = vpow2.f32 %v378_v1  ;;  %v379_v6 = vmul.f32 -1.442695, %v260_v2 }
 0x1c9   :  { %454 = vpow2.f32 %v376_v4  ;;  %v377_v7 = vmul.f32 -1.442695, %v252_v5 }
 0x1ca   :  { %v445_v8 = vpop.eup %444  ;;  %456 = vpow2.f32 %v379_v6 }
 0x1cb   :  { %v447_v9 = vpop.eup %446  ;;  %v289_v10 = vadd.f32 1.0, %v445_v8  ;;  %458 = vpow2.f32 %v377_v7 }
 0x1cc   :  { %v449_v11 = vpop.eup %448  ;;  %v287_v12 = vadd.f32 1.0, %v447_v9 }
 0x1cd   :  { %v451_v13 = vpop.eup %450  ;;  %460 = vrcp.f32 %v289_v10  ;;  %v290_v14 = vadd.f32 1.0, %v449_v11 }
 0x1ce   :  { %462 = vrcp.f32 %v287_v12  ;;  %v288_v15 = vadd.f32 1.0, %v451_v13 }
 0x1cf   :  { %464 = vrcp.f32 %v290_v14 }
 0x1d0   :  { %466 = vrcp.f32 %v288_v15 }
 0x1d2   :  { %v453_v16 = vpop.eup %452 }
 0x1d3   :  { %v455_v17 = vpop.eup %454  ;;  %v293_v18 = vadd.f32 1.0, %v453_v16 }
 0x1d4   :  { %v457_v19 = vpop.eup %456  ;;  %v291_v20 = vadd.f32 1.0, %v455_v17 }
 0x1d5   :  { %v459_v21 = vpop.eup %458  ;;  %468 = vrcp.f32 %v293_v18  ;;  %v294_v22 = vadd.f32 1.0, %v457_v19 }
 0x1d6   :  { %470 = vrcp.f32 %v291_v20  ;;  %v292_v23 = vadd.f32 1.0, %v459_v21 }
 0x1d7   :  { %v461_v24 = vpop.eup %460  ;;  %472 = vrcp.f32 %v294_v22 }
 0x1d8   :  { %v463_v25 = vpop.eup %462  ;;  %v390_v26 = vpack.c.bf16 %v461_v24, %v461_v24  ;;  %474 = vrcp.f32 %v292_v23 }
 0x1d9   :  { %v465_v27 = vpop.eup %464  ;;  %v388_v28 = vpack.c.bf16 %v463_v25, %v463_v25 }
 0x1da   :  { %v467_v29 = vpop.eup %466  ;;  %346 = vst.msk [vmem:[%s599_s5 + $0x8] sm:$0xf] %vm343_vm2, %v390_v26  ;;  %v391_v30 = vpack.c.bf16 %v465_v27, %v465_v27 }
 0x1db   :  { %344 = vst.msk [vmem:[%s599_s5] sm:$0xf] %vm343_vm2, %v388_v28  ;;  %v389_v31 = vpack.c.bf16 %v467_v29, %v467_v29 }
 0x1dc   :  { %347 = vst.msk [vmem:[%s599_s5 + $0xc] sm:$0xf] %vm343_vm2, %v391_v30 }
 0x1dd   :  { %345 = vst.msk [vmem:[%s599_s5 + $0x4] sm:$0xf] %vm343_vm2, %v389_v31 }
 0x1df   :  { %v469_v32 = vpop.eup %468 }
 0x1e0   :  { %v471_v33 = vpop.eup %470  ;;  %v394_v34 = vpack.c.bf16 %v469_v32, %v469_v32 }
 0x1e1   :  { %v473_v35 = vpop.eup %472  ;;  %v392_v36 = vpack.c.bf16 %v471_v33, %v471_v33 }
 0x1e2   :  { %v475_v37 = vpop.eup %474  ;;  %350 = vst.msk [vmem:[%s599_s5 + $0x18] sm:$0xf] %vm343_vm2, %v394_v34  ;;  %v395_v38 = vpack.c.bf16 %v473_v35, %v473_v35 }
 0x1e3   :  { %348 = vst.msk [vmem:[%s599_s5 + $0x10] sm:$0xf] %vm343_vm2, %v392_v36  ;;  %v393_v39 = vpack.c.bf16 %v475_v37, %v475_v37 }
 0x1e4   :  { %351 = vst.msk [vmem:[%s599_s5 + $0x1c] sm:$0xf] %vm343_vm2, %v395_v38 }
 0x1e5   :  { %349 = vst.msk [vmem:[%s599_s5 + $0x14] sm:$0xf] %vm343_vm2, %v393_v39 }

</bundles_post_ra>
